<compile_context>
chip_gen: v7x
topology: tpu7x:2x2x1
jax: 0.10.0
libtpu: 0.0.40
codegen_flags: <defaults>
</compile_context>

<pallas_src>
import math

import jax
import jax.numpy as jnp
from jax.experimental import pallas as pl
from jax.experimental.pallas import tpu as pltpu


def _round_up(n, m):
    return ((n + m - 1) // m) * m


def _make_actor_kernel(action_scale: float, action_dim: int):
    # Plain Python scalars -> inlined literals (no captured jnp constants).
    scale = float(action_scale)

    def actor_kernel(x_ref, w1_ref, b1_ref, w2_ref, b2_ref, wh_ref, bh_ref,
                     out_ref):
        x = x_ref[...]

        # net: Linear -> ReLU -> Linear -> ReLU  (f32 accumulation).
        h = jnp.dot(x, w1_ref[...], preferred_element_type=jnp.float32)
        h = jnp.maximum(h + b1_ref[...], 0.0)
        h = h.astype(w2_ref.dtype)            # no-op in the f32 path
        h = jnp.dot(h, w2_ref[...], preferred_element_type=jnp.float32)
        h = jnp.maximum(h + b2_ref[...], 0.0)
        h = h.astype(wh_ref.dtype)

        # Fused heads: columns [0:A) -> mean, [A:2A) -> std, rest zero padding.
        z = jnp.dot(h, wh_ref[...], preferred_element_type=jnp.float32)
        z = z + bh_ref[...]

        mean = jnp.tanh(z) * scale
        # softplus: exp overflow -> inf is absorbed by min(., 1.0); softplus>=0
        # makes the 1e-5 lower clamp dead, so no extra guards/compares needed.
        std = jnp.minimum(jnp.log1p(jnp.exp(z)) + 1e-5, 1.0)

        col = jax.lax.broadcasted_iota(jnp.int32, z.shape, 1)
        out_ref[...] = jnp.where(col < action_dim, mean, std).astype(out_ref.dtype)

    return actor_kernel


def prepare_actor_params(params, compute_dtype=jnp.bfloat16):
    """One-time weight preparation (hoisted out of the per-call path).

    Fuses the two head weights into a lane-dense (H, P) slab (P = multiple of
    128), pads, and casts matmul operands to `compute_dtype`.  Biases stay f32.
    Call once and reuse the result for every `actor_forward` call.
    """
    cd = jnp.dtype(compute_dtype)
    S, H = params["w1"].shape
    A = params["wm"].shape[1]
    P = max(128, _round_up(2 * A, 128))

    wh = jnp.concatenate([params["wm"], params["ws"]], axis=1)
    wh = jnp.pad(wh, ((0, 0), (0, P - 2 * A)))
    bh = jnp.concatenate([params["bm"], params["bs"]], axis=1)
    bh = jnp.pad(bh, ((0, 0), (0, P - 2 * A)))

    return dict(
        w1=params["w1"].astype(cd),
        b1=params["b1"].astype(jnp.float32),
        w2=params["w2"].astype(cd),
        b2=params["b2"].astype(jnp.float32),
        wh=wh.astype(cd),
        bh=bh.astype(jnp.float32),
        state_dim=S, hidden_dim=H, action_dim=A, padded_head=P,
        compute_dtype=cd,
    )


def actor_forward(x, prep, action_scale=1.0, *, block_b=512,
                  out_dtype=jnp.float32):
    """x: (B, state_dim). prep: output of `prepare_actor_params`.

    Returns (mean, std), both (B, action_dim) in `out_dtype`."""
    B, S = x.shape
    assert S == prep["state_dim"]
    H = prep["hidden_dim"]
    A = prep["action_dim"]
    P = prep["padded_head"]
    cd = prep["compute_dtype"]

    # Batch tiling: bound padding to <8 rows per tile; force >=2 tiles when the
    # batch is large enough so v7x megacore gets both TensorCores busy.
    min_tiles = 2 if B >= 64 else 1
    num_tiles = max(pl.cdiv(B, block_b), min_tiles)
    tb = _round_up(pl.cdiv(B, num_tiles), 8)
    Bp = tb * num_tiles
    xp = x if Bp == B else jnp.pad(x, ((0, Bp - B), (0, 0)))
    xp = xp.astype(cd)

    itemsize = jnp.dtype(cd).itemsize
    out_itemsize = jnp.dtype(out_dtype).itemsize

    # VMEM footprint: double-buffered x & out tiles, weights/biases (counted
    # double-buffered to be safe), plus live f32 intermediates + headroom.
    vmem_bytes = (
        2 * tb * S * itemsize                       # x (double-buffered)
        + 2 * tb * P * out_itemsize                 # out (double-buffered)
        + 2 * (S * H + H * H + H * P) * itemsize    # weights
        + 2 * (2 * H + P) * 4                       # biases
        + 3 * tb * H * 4                            # live f32 intermediates
    )
    vmem_limit = min(max(int(vmem_bytes * 1.5), 4 << 20), 64 << 20)

    cost = pl.CostEstimate(
        flops=2 * Bp * (S * H + H * H + H * P),
        transcendentals=3 * Bp * P,                 # tanh + exp + log1p
        bytes_accessed=(Bp * S * itemsize
                        + (S * H + H * H + H * P) * itemsize
                        + (2 * H + P) * 4
                        + Bp * P * out_itemsize),
    )

    slab = pl.pallas_call(
        _make_actor_kernel(action_scale, A),
        out_shape=jax.ShapeDtypeStruct((Bp, P), out_dtype),
        grid=(num_tiles,),
        in_specs=[
            pl.BlockSpec((tb, S), lambda i: (i, 0)),   # x: batch-tiled
            pl.BlockSpec((S, H), lambda i: (0, 0)),    # w1
            pl.BlockSpec((1, H), lambda i: (0, 0)),    # b1
            pl.BlockSpec((H, H), lambda i: (0, 0)),    # w2
            pl.BlockSpec((1, H), lambda i: (0, 0)),    # b2
            pl.BlockSpec((H, P), lambda i: (0, 0)),    # fused head weight
            pl.BlockSpec((1, P), lambda i: (0, 0)),    # fused head bias
        ],
        out_specs=pl.BlockSpec((tb, P), lambda i: (i, 0)),
        compiler_params=pltpu.CompilerParams(
            dimension_semantics=("parallel",),
            vmem_limit_bytes=vmem_limit,
        ),
        cost_estimate=cost,
    )(xp, prep["w1"], prep["b1"], prep["w2"], prep["b2"],
      prep["wh"], prep["bh"])

    mean = slab[:B, :A]
    std = slab[:B, A:2 * A]
    return mean, std


def init_actor_params(key, state_dim, action_dim, hidden_dim=256):
    """PyTorch-style uniform(-1/sqrt(fan_in), 1/sqrt(fan_in)) init.

    Weights stored as (in_features, out_features)."""
    def linear(key, fan_in, fan_out):
        kw, kb = jax.random.split(key)
        bound = 1.0 / math.sqrt(fan_in)
        w = jax.random.uniform(kw, (fan_in, fan_out), jnp.float32, -bound, bound)
        b = jax.random.uniform(kb, (1, fan_out), jnp.float32, -bound, bound)
        return w, b

    k1, k2, k3, k4 = jax.random.split(key, 4)
    w1, b1 = linear(k1, state_dim, hidden_dim)
    w2, b2 = linear(k2, hidden_dim, hidden_dim)
    wm, bm = linear(k3, hidden_dim, action_dim)
    ws, bs = linear(k4, hidden_dim, action_dim)
    return dict(w1=w1, b1=b1, w2=w2, b2=b2, wm=wm, bm=bm, ws=ws, bs=bs)


def actor_forward_ref(x, params, action_scale=1.0):
    """Pure-JAX f32 reference."""
    h = jnp.maximum(x @ params["w1"] + params["b1"], 0.0)
    h = jnp.maximum(h @ params["w2"] + params["b2"], 0.0)
    mean = jnp.tanh(h @ params["wm"] + params["bm"]) * action_scale
    s = h @ params["ws"] + params["bs"]
    std = jnp.clip(jax.nn.softplus(s) + 1e-5, 1e-5, 1.0)
    return mean, std


# TODO(synk): get_distribution / get_log_prob (torch.distributions.Normal) are
# not part of forward(); implement as plain JAX around (mean, std) if needed.

if __name__ == "__main__":
    # Small shapes consistent with the module: state-vector input.
    # batch=10 deliberately non-multiple-of-8 to exercise batch padding.
    batch, state_dim, action_dim, hidden_dim = 10, 16, 4, 32
    action_scale = 1.0

    key = jax.random.PRNGKey(0)
    kx, kp = jax.random.split(key)
    x = jax.random.normal(kx, (batch, state_dim), jnp.float32)
    params = init_actor_params(kp, state_dim, action_dim, hidden_dim)

    mean_ref, std_ref = actor_forward_ref(x, params, action_scale)

    # f32 path: strict check against the reference.
    prep_f32 = prepare_actor_params(params, compute_dtype=jnp.float32)
    mean, std = actor_forward(x, prep_f32, action_scale)
    jax.block_until_ready((mean, std))
    assert mean.shape == (batch, action_dim) and std.shape == (batch, action_dim)
    assert jnp.allclose(mean, mean_ref, atol=1e-5), "mean mismatch (f32)"
    assert jnp.allclose(std, std_ref, atol=1e-5), "std mismatch (f32)"

    # bf16 path: production path (default), loose tolerance.
    prep_bf16 = prepare_actor_params(params)          # bf16 weights, prepared once
    mean_bf, std_bf = actor_forward(x, prep_bf16, action_scale)
    jax.block_until_ready((mean_bf, std_bf))
    assert jnp.allclose(mean_bf, mean_ref, atol=5e-2), "mean mismatch (bf16)"
    assert jnp.allclose(std_bf, std_ref, atol=5e-2), "std mismatch (bf16)"

    print("KERNEL_OK")
</pallas_src>

<mosaic_0001>
module attributes {stable_mosaic.version = 11 : i64} {
  func.func @actor_kernel(%arg0: i32, %arg1: memref<16x16xf32, #tpu.memory_space<vmem>>, %arg2: memref<16x32xf32, #tpu.memory_space<vmem>>, %arg3: memref<1x32xf32, #tpu.memory_space<vmem>>, %arg4: memref<32x32xf32, #tpu.memory_space<vmem>>, %arg5: memref<1x32xf32, #tpu.memory_space<vmem>>, %arg6: memref<32x128xf32, #tpu.memory_space<vmem>>, %arg7: memref<1x128xf32, #tpu.memory_space<vmem>>, %arg8: memref<16x128xf32, #tpu.memory_space<vmem>>) attributes {dimension_semantics = [#tpu.dimension_semantics<parallel>], iteration_bounds = array<i64: 1>, scalar_prefetch = 0 : i64, scratch_operands = 0 : i64, tpu.core_type = #tpu.core_type<tc>, window_params = [{transform_indices = @transform_0, window_bounds = array<i64: 16, 16>}, {pipeline_mode = #tpu.pipeline_mode<synchronous>, transform_indices = @transform_1, window_bounds = array<i64: 16, 32>}, {pipeline_mode = #tpu.pipeline_mode<synchronous>, transform_indices = @transform_2, window_bounds = array<i64: 1, 32>}, {pipeline_mode = #tpu.pipeline_mode<synchronous>, transform_indices = @transform_3, window_bounds = array<i64: 32, 32>}, {pipeline_mode = #tpu.pipeline_mode<synchronous>, transform_indices = @transform_4, window_bounds = array<i64: 1, 32>}, {pipeline_mode = #tpu.pipeline_mode<synchronous>, transform_indices = @transform_5, window_bounds = array<i64: 32, 128>}, {pipeline_mode = #tpu.pipeline_mode<synchronous>, transform_indices = @transform_6, window_bounds = array<i64: 1, 128>}, {transform_indices = @transform_7, window_bounds = array<i64: 16, 128>}]} {
    %c0 = arith.constant 0 : index
    %c0_0 = arith.constant 0 : index
    %0 = vector.load %arg1[%c0, %c0_0] : memref<16x16xf32, #tpu.memory_space<vmem>>, vector<16x16xf32>
    %c0_1 = arith.constant 0 : index
    %c0_2 = arith.constant 0 : index
    %1 = vector.load %arg2[%c0_1, %c0_2] : memref<16x32xf32, #tpu.memory_space<vmem>>, vector<16x32xf32>
    %cst = arith.constant dense<0.000000e+00> : vector<16x32xf32>
    %2 = tpu.matmul %0, %1, %cst {dimension_numbers = #tpu.dot_dimension_numbers<[1], [0], [0], [1], [0, 0, 1, 1], [], []>} : vector<16x16xf32>, vector<16x32xf32>, vector<16x32xf32> -> vector<16x32xf32>
    %c0_3 = arith.constant 0 : index
    %c0_4 = arith.constant 0 : index
    %3 = vector.load %arg3[%c0_3, %c0_4] : memref<1x32xf32, #tpu.memory_space<vmem>>, vector<1x32xf32>
    %4 = vector.broadcast %3 : vector<1x32xf32> to vector<16x32xf32>
    %5 = arith.addf %2, %4 : vector<16x32xf32>
    %cst_5 = arith.constant 0.000000e+00 : f32
    %6 = vector.broadcast %cst_5 : f32 to vector<16x32xf32>
    %7 = arith.maximumf %5, %6 : vector<16x32xf32>
    %c0_6 = arith.constant 0 : index
    %c0_7 = arith.constant 0 : index
    %8 = vector.load %arg4[%c0_6, %c0_7] : memref<32x32xf32, #tpu.memory_space<vmem>>, vector<32x32xf32>
    %cst_8 = arith.constant dense<0.000000e+00> : vector<16x32xf32>
    %9 = tpu.matmul %7, %8, %cst_8 {dimension_numbers = #tpu.dot_dimension_numbers<[1], [0], [0], [1], [0, 0, 1, 1], [], []>} : vector<16x32xf32>, vector<32x32xf32>, vector<16x32xf32> -> vector<16x32xf32>
    %c0_9 = arith.constant 0 : index
    %c0_10 = arith.constant 0 : index
    %10 = vector.load %arg5[%c0_9, %c0_10] : memref<1x32xf32, #tpu.memory_space<vmem>>, vector<1x32xf32>
    %11 = vector.broadcast %10 : vector<1x32xf32> to vector<16x32xf32>
    %12 = arith.addf %9, %11 : vector<16x32xf32>
    %cst_11 = arith.constant 0.000000e+00 : f32
    %13 = vector.broadcast %cst_11 : f32 to vector<16x32xf32>
    %14 = arith.maximumf %12, %13 : vector<16x32xf32>
    %c0_12 = arith.constant 0 : index
    %c0_13 = arith.constant 0 : index
    %15 = vector.load %arg6[%c0_12, %c0_13] : memref<32x128xf32, #tpu.memory_space<vmem>>, vector<32x128xf32>
    %cst_14 = arith.constant dense<0.000000e+00> : vector<16x128xf32>
    %16 = tpu.matmul %14, %15, %cst_14 {dimension_numbers = #tpu.dot_dimension_numbers<[1], [0], [0], [1], [0, 0, 1, 1], [], []>} : vector<16x32xf32>, vector<32x128xf32>, vector<16x128xf32> -> vector<16x128xf32>
    %c0_15 = arith.constant 0 : index
    %c0_16 = arith.constant 0 : index
    %17 = vector.load %arg7[%c0_15, %c0_16] : memref<1x128xf32, #tpu.memory_space<vmem>>, vector<1x128xf32>
    %18 = vector.broadcast %17 : vector<1x128xf32> to vector<16x128xf32>
    %19 = arith.addf %16, %18 : vector<16x128xf32>
    %20 = math.tanh %19 : vector<16x128xf32>
    %cst_17 = arith.constant 1.000000e+00 : f32
    %21 = vector.broadcast %cst_17 : f32 to vector<16x128xf32>
    %22 = arith.mulf %20, %21 : vector<16x128xf32>
    %23 = math.exp %19 : vector<16x128xf32>
    %24 = math.log1p %23 : vector<16x128xf32>
    %cst_18 = arith.constant 9.99999974E-6 : f32
    %25 = vector.broadcast %cst_18 : f32 to vector<16x128xf32>
    %26 = arith.addf %24, %25 : vector<16x128xf32>
    %cst_19 = arith.constant 1.000000e+00 : f32
    %27 = vector.broadcast %cst_19 : f32 to vector<16x128xf32>
    %28 = arith.minimumf %26, %27 : vector<16x128xf32>
    %29 = tpu.iota {dimensions = array<i32: 1>} : vector<16x128xi32>
    %c4_i32 = arith.constant 4 : i32
    %30 = vector.broadcast %c4_i32 : i32 to vector<16x128xi32>
    %31 = arith.cmpi slt, %29, %30 : vector<16x128xi32>
    %32 = arith.select %31, %22, %28 : vector<16x128xi1>, vector<16x128xf32>
    %c0_20 = arith.constant 0 : index
    %c0_21 = arith.constant 0 : index
    %33 = vector.load %arg8[%c0_20, %c0_21] : memref<16x128xf32, #tpu.memory_space<vmem>>, vector<16x128xf32>
    tpu.vector_store %arg8[%c0_20, %c0_21], %32 {strides = array<i32>} : memref<16x128xf32, #tpu.memory_space<vmem>>, vector<16x128xf32>,
    return
  }
  func.func @transform_0(%arg0: i32) -> (i32, i32) {
    %c0_i32 = arith.constant 0 : i32
    %c0_i32_0 = arith.constant 0 : i32
    return %arg0, %c0_i32 : i32, i32
  }
  func.func @transform_1(%arg0: i32) -> (i32, i32) {
    %c0_i32 = arith.constant 0 : i32
    %c0_i32_0 = arith.constant 0 : i32
    %c0_i32_1 = arith.constant 0 : i32
    return %c0_i32, %c0_i32_0 : i32, i32
  }
  func.func @transform_2(%arg0: i32) -> (i32, i32) {
    %c0_i32 = arith.constant 0 : i32
    %c0_i32_0 = arith.constant 0 : i32
    %c0_i32_1 = arith.constant 0 : i32
    return %c0_i32, %c0_i32_0 : i32, i32
  }
  func.func @transform_3(%arg0: i32) -> (i32, i32) {
    %c0_i32 = arith.constant 0 : i32
    %c0_i32_0 = arith.constant 0 : i32
    %c0_i32_1 = arith.constant 0 : i32
    return %c0_i32, %c0_i32_0 : i32, i32
  }
  func.func @transform_4(%arg0: i32) -> (i32, i32) {
    %c0_i32 = arith.constant 0 : i32
    %c0_i32_0 = arith.constant 0 : i32
    %c0_i32_1 = arith.constant 0 : i32
    return %c0_i32, %c0_i32_0 : i32, i32
  }
  func.func @transform_5(%arg0: i32) -> (i32, i32) {
    %c0_i32 = arith.constant 0 : i32
    %c0_i32_0 = arith.constant 0 : i32
    %c0_i32_1 = arith.constant 0 : i32
    return %c0_i32, %c0_i32_0 : i32, i32
  }
  func.func @transform_6(%arg0: i32) -> (i32, i32) {
    %c0_i32 = arith.constant 0 : i32
    %c0_i32_0 = arith.constant 0 : i32
    %c0_i32_1 = arith.constant 0 : i32
    return %c0_i32, %c0_i32_0 : i32, i32
  }
  func.func @transform_7(%arg0: i32) -> (i32, i32) {
    %c0_i32 = arith.constant 0 : i32
    %c0_i32_0 = arith.constant 0 : i32
    return %arg0, %c0_i32 : i32, i32
  }
}

</mosaic_0001>

<bundles_post_ra>
// kernel: tpu_custom_call.1
= control target key start
LH: loop header
LB: loop body
LE: loop exit
PB: predicated region body
PF: predicated region fallthrough
CT: control target
= control target key end

     0   :  { %12 = vsyncpa [#allocation3], 0  ;;  %s778_s0 = inlined_call_operand.hbm [shape: f32[16,16], index: 0, kind: input, shape index: {}]   ;;  %s779_s1 = inlined_call_operand.hbm [shape: f32[16,32], index: 1, kind: input, shape index: {}]   ;;  %s780_s2 = inlined_call_operand.vmem [shape: f32[1,32], index: 2, kind: input, shape index: {}]   ;;  %s781_s3 = inlined_call_operand.hbm [shape: f32[32,32], index: 3, kind: input, shape index: {}]   ;;  %s782_s4 = inlined_call_operand.vmem [shape: f32[1,32], index: 4, kind: input, shape index: {}]   ;;  %s783_s5 = inlined_call_operand.hbm [shape: f32[32,128], index: 5, kind: input, shape index: {}]   ;;  %s784_s6 = inlined_call_operand.vmem [shape: f32[1,128], index: 6, kind: input, shape index: {}]   ;;  %s785_s7 = inlined_call_operand.hbm [shape: f32[16,128], index: 7, kind: output, shape index: {}]  }
   0x1   :  { %13 = vsyncpa [#allocation6], 0 }
   0x2   :  { %14 = vsyncpa [#allocation9], 0 }
   0x3   :  { %15 = vsyncpa [#allocation4], 0  ;;  %s629_s24 = smov [#allocation5]   ;;  %s630_s26 = smov [#allocation2]  }
   0x4   :  { %s33_s25 = sshll.u32 %s629_s24, 4  ;;  %s21_s27 = sshll.u32 %s630_s26, 4  ;;  %s34_s25 = int_to_ptr.vmem [resolvable:$true] %s33_s25  ;;  %s676_s27 = int_to_ptr.vmem [resolvable:$true] %s21_s27 }
   0x5   :  { %s511_s30 = scalar_lea.hbm %s779_s1, 256 }
   0x6   :  { %p512_p0 = scmp.ne.s32.totalorder %s779_s1, %s511_s30  ;;  %p515_p1 = scmp.lt.u32.totalorder %s511_s30, %s779_s1 }
   0x8   :  { %p517_p2 = pnand %p515_p1, %p512_p0 }
   0xa   :  { %520 = shalt.err (!%p517_p2)
}
   0xb   :  { %s521_s12 = scalar_lea.vmem %s34_s25, 256  ;;  %p526_p4 = scmp.lt.s32.totalorder %s34_s25, %s34_s25 }
   0xc   :  { %p522_p3 = scmp.ne.s32.totalorder %s34_s25, %s521_s12  ;;  %p527_p5 = scmp.lt.s32.totalorder %s521_s12, %s521_s12 }
   0xe   :  { %p528_p6 = por %p527_p5, %p526_p4 }
  0x10   :  { %p529_p7 = pnand %p528_p6, %p522_p3 }
  0x12   :  { %532 = shalt.err (!%p529_p7)
}
  0x13   :  { %s631_s13 = smov 128   ;;  %s632_s14 = smov 8  }
  0x14   :  { %39 = dma.hbm_to_vmem [thread:$0]  %s779_s1, 256, %s34_s25, [#allocation6], %s631_s13, %s631_s13, %s632_s14  }
  0x15   :  { %s533_s19 = scalar_lea.hbm %s778_s0, 256 }
  0x16   :  { %p534_p8 = scmp.ne.s32.totalorder %s778_s0, %s533_s19  ;;  %p537_p9 = scmp.lt.u32.totalorder %s533_s19, %s778_s0 }
  0x18   :  { %p539_p10 = pnand %p537_p9, %p534_p8 }
  0x1a   :  { %542 = shalt.err (!%p539_p10)
}
  0x1b   :  { %s543_s24 = scalar_lea.vmem %s676_s27, 256  ;;  %p548_p12 = scmp.lt.s32.totalorder %s676_s27, %s676_s27 }
  0x1c   :  { %p544_p11 = scmp.ne.s32.totalorder %s676_s27, %s543_s24  ;;  %p549_p13 = scmp.lt.s32.totalorder %s543_s24, %s543_s24 }
  0x1e   :  { %p550_p0 = por %p549_p13, %p548_p12 }
  0x20   :  { %p551_p1 = pnand %p550_p0, %p544_p11 }
  0x22   :  { %554 = shalt.err (!%p551_p1)
}
  0x23   :  { %27 = dma.hbm_to_vmem [thread:$0]  %s778_s0, 256, %s676_s27, [#allocation3], %s631_s13, %s631_s13, %s632_s14  }
  0x24   :  { %s633_s26 = smov [#allocation7]   ;;  %s634_s29 = smov [#allocation8]  }
  0x25   :  { %s47_s28 = sshll.u32 %s633_s26, 4  ;;  %s61_s30 = sshll.u32 %s634_s29, 4  ;;  %s48_s28 = int_to_ptr.vmem [resolvable:$true] %s47_s28  ;;  %s713_s30 = int_to_ptr.vmem [resolvable:$true] %s61_s30 }
  0x26   :  { %s555_s10 = scalar_lea.hbm %s781_s3, 512 }
  0x27   :  { %p556_p2 = scmp.ne.s32.totalorder %s781_s3, %s555_s10  ;;  %p559_p3 = scmp.lt.u32.totalorder %s555_s10, %s781_s3 }
  0x29   :  { %p561_p4 = pnand %p559_p3, %p556_p2 }
  0x2b   :  { %564 = shalt.err (!%p561_p4)
}
  0x2c   :  { %s565_s0 = scalar_lea.vmem %s48_s28, 512  ;;  %p570_p6 = scmp.lt.s32.totalorder %s48_s28, %s48_s28 }
  0x2d   :  { %p566_p5 = scmp.ne.s32.totalorder %s48_s28, %s565_s0  ;;  %p571_p7 = scmp.lt.s32.totalorder %s565_s0, %s565_s0 }
  0x2f   :  { %p572_p8 = por %p571_p7, %p570_p6 }
  0x31   :  { %p573_p9 = pnand %p572_p8, %p566_p5 }
  0x33   :  { %576 = shalt.err (!%p573_p9)
}
  0x34   :  { %53 = dma.hbm_to_vmem [thread:$0]  %s781_s3, 512, %s48_s28, [#allocation6], %s631_s13, %s631_s13, %s632_s14  }
  0x35   :  { %s577_s20 = scalar_lea.hbm %s783_s5, 512 }
  0x36   :  { %p578_p10 = scmp.ne.s32.totalorder %s783_s5, %s577_s20  ;;  %p581_p11 = scmp.lt.u32.totalorder %s577_s20, %s783_s5 }
  0x38   :  { %p583_p12 = pnand %p581_p11, %p578_p10 }
  0x3a   :  { %586 = shalt.err (!%p583_p12)
}
  0x3b   :  { %s587_s1 = scalar_lea.vmem %s713_s30, 512  ;;  %p592_p0 = scmp.lt.s32.totalorder %s713_s30, %s713_s30 }
  0x3c   :  { %p588_p13 = scmp.ne.s32.totalorder %s713_s30, %s587_s1  ;;  %p593_p1 = scmp.lt.s32.totalorder %s587_s1, %s587_s1 }
  0x3e   :  { %p594_p2 = por %p593_p1, %p592_p0 }
  0x40   :  { %p595_p3 = pnand %p594_p2, %p588_p13 }
  0x42   :  { %598 = shalt.err (!%p595_p3)
}
  0x43   :  { %67 = dma.hbm_to_vmem [thread:$0]  %s783_s5, 512, %s713_s30, [#allocation9], %s631_s13, %s631_s13, %s632_s14  }
  0x44   :  { %621 = dma.done.wait [#allocation3], 256  }
  0x45   :  { %622 = vsyncadd [#allocation3], 4294967040 }
  0x46   :  { %623 = dma.done.wait [#allocation6], 768  }
  0x47   :  { %624 = vsyncadd [#allocation6], 4294966528 }
  0x48   :  { %625 = dma.done.wait [#allocation9], 512  }
  0x49   :  { %626 = vsyncadd [#allocation9], 4294966784  ;;  %vm93_vm0 = vcmask 130048   ;;  %v84_v0 = vld [vmem:[#allocation5] sm:$0xff]  ;;  %v85_v1 = vld [vmem:[#allocation5 + $0x8] sm:$0xff]  ;;  %vm188_vm1 = vcmask 261120   ;;  %v392_v45 = vlaneseq }
  0x4a   :  { %v82_v2 = vld [vmem:[#allocation2] sm:$0xff]  ;;  %v472_v3 = vpack.c.bf16 %v85_v1, %v84_v0  ;;  %v178_v5 = vld [vmem:[#allocation7 + $0x8] sm:$0xff]  ;;  %v179_v8 = vld [vmem:[#allocation7 + $0x10] sm:$0xff] }
  0x4b   :  { %447 = vmatprep.mubr.msk.f32.mxu0 %vm93_vm0, %v82_v2  ;;  %v177_v4 = vld [vmem:[#allocation7] sm:$0xff]  ;;  %v83_v7 = vld [vmem:[#allocation2 + $0x8] sm:$0xff]  ;;  %v180_v9 = vld [vmem:[#allocation7 + $0x18] sm:$0xff]  ;;  %v393_v53 = vand.u32 127, %v392_v45 }
  0x4c   :  { %v476_v6 = vpack.c.bf16 %v178_v5, %v177_v4  ;;  %473 = vmatprep.subr.bf16.mxu0 %v472_v3  ;;  %v480_v10 = vpack.c.bf16 %v180_v9, %v179_v8  ;;  %v272_v11 = vld [vmem:[#allocation8] sm:$0xff]  ;;  %v273_v12 = vld [vmem:[#allocation8 + $0x8] sm:$0xff]  ;;  %v274_v21 = vld [vmem:[#allocation8 + $0x10] sm:$0xff] }
  0x4d   :  { %475 = vmatpush3.bf16.msra.mxu0 %v472_v3  ;;  %v484_v13 = vpack.c.bf16 %v273_v12, %v272_v11  ;;  %v418_v14 = vld [vmem:[%s780_s2] ss:$0 sm:$0xff]  ;;  %v275_v22 = vld [vmem:[#allocation8 + $0x18] sm:$0xff]  ;;  %vm394_vm4 = vcmp.lt.s32.totalorder %v393_v53, 4 }
  0x4e   :  { %477 = vmatprep.subr.bf16.mxu1 %v476_v6  ;;  %v488_v23 = vpack.c.bf16 %v275_v22, %v274_v21  ;;  %v421_v24 = vld [vmem:[%s782_s4] ss:$0 sm:$0xff]  ;;  %s635_s4 = smov [#allocation10]  }
  0x4f   :  { %479 = vmatpush3.bf16.msra.mxu1 %v476_v6  ;;  %485 = vmatprep.subr.bf16.mxu0 %v484_v13  ;;  %v424_v31 = vld [vmem:[%s784_s6] ss:$0 sm:$0xff]  ;;  %s404_s6 = sshll.u32 %s635_s4, 4  ;;  %s405_s6 = int_to_ptr.vmem [resolvable:$true] %s404_s6 }
  0x50   :  { %448 = vmatmul.mubr.msk.f32.vlgmr.msra.gmra.mrb[0].mxu0 %vm93_vm0, %v83_v7  ;;  %481 = vmatprep.subr.bf16.mxu1 %v480_v10  ;;  %s599_s8 = scalar_lea.vmem %s405_s6, 256  ;;  %p604_p5 = scmp.lt.s32.totalorder %s405_s6, %s405_s6 }
  0x51   :  { %487 = vmatpush3.bf16.msra.mxu0 %v484_v13  ;;  %p600_p4 = scmp.ne.s32.totalorder %s405_s6, %s599_s8  ;;  %p605_p6 = scmp.lt.s32.totalorder %s599_s8, %s599_s8 }
  0x52   :  { %489 = vmatprep.subr.bf16.mxu0 %v488_v23 }
  0x53   :  { %483 = vmatpush3.bf16.msra.mxu1 %v480_v10  ;;  %p606_p7 = por %p605_p6, %p604_p5 }
  0x55   :  { %491 = vmatpush3.bf16.msra.mxu0 %v488_v23  ;;  %p607_p8 = pnand %p606_p7, %p600_p4 }
 0x123   :  { %v449_v15 = vpop.f32.mrb[0].mxu0 }
 0x124   :  { %v172_v16 = vadd.f32 %v449_v15, %v418_v14  ;;  %v166_v17 = vpop.f32.mrb[1].mxu0 }
 0x125   :  { %v167_v18 = vadd.f32 %v418_v14, %v166_v17 }
 0x126   :  { %v176_v20 = vmax.f32 %v172_v16, 0.0 }
 0x127   :  { %v175_v19 = vmax.f32 %v167_v18, 0.0 }
 0x129   :  { %458 = vmatprep.mubr.msk.f32.mxu1 %vm188_vm1, %v175_v19 }
 0x12a   :  { %459 = vmatmul.mubr.msk.f32.vlgmr.msra.gmra.mrb[0].mxu1 %vm188_vm1, %v176_v20 }
 0x1fd   :  { %v460_v25 = vpop.f32.mrb[0].mxu1 }
 0x1fe   :  { %v267_v26 = vadd.f32 %v460_v25, %v421_v24  ;;  %v261_v27 = vpop.f32.mrb[1].mxu1 }
 0x1ff   :  { %v262_v28 = vadd.f32 %v421_v24, %v261_v27 }
 0x200   :  { %v271_v30 = vmax.f32 %v267_v26, 0.0 }
 0x201   :  { %v270_v29 = vmax.f32 %v262_v28, 0.0 }
 0x203   :  { %469 = vmatprep.mubr.msk.f32.mxu0 %vm188_vm1, %v270_v29 }
 0x204   :  { %470 = vmatmul.mubr.msk.f32.vlgmr.msra.gmra.mrb[2].mxu0 %vm188_vm1, %v271_v30 }
 0x2d7   :  { %v471_v32 = vpop.f32.mrb[2].mxu0 }
 0x2d8   :  { %v361_v33 = vadd.f32 %v471_v32, %v424_v31  ;;  %v355_v34 = vpop.f32.mrb[3].mxu0 }
 0x2d9   :  { %v356_v35 = vadd.f32 %v424_v31, %v355_v34 }
 0x2da   :  { %v368_v36 = vmul.f32 1.442695, %v361_v33 }
 0x2db   :  { %v366_v37 = vmul.f32 1.442695, %v356_v35 }
 0x2dc   :  { %499 = vpow2.f32 %v368_v36 }
 0x2dd   :  { %501 = vpow2.f32 %v366_v37 }
 0x2e6   :  { %v500_v38 = vpop.eup %499 }
 0x2e7   :  { %v502_v39 = vpop.eup %501  ;;  %v379_v40 = vadd.f32 1.0, %v500_v38  ;;  %v382_v42 = vmul.f32 -0.5, %v500_v38  ;;  %v385_v47 = vand.u32 2147483647, %v500_v38 }
 0x2e8   :  { %v370_v41 = vadd.f32 1.0, %v502_v39  ;;  %v373_v43 = vmul.f32 -0.5, %v502_v39  ;;  %v376_v48 = vand.u32 2147483647, %v502_v39 }
 0x2e9   :  { %503 = vlog2.f32 %v379_v40  ;;  %v383_v44 = vadd.f32 1.0, %v382_v42  ;;  %vm386_vm2 = vcmp.lt.f32.partialorder %v385_v47, 0.0004427343 }
 0x2ea   :  { %505 = vlog2.f32 %v370_v41  ;;  %v374_v46 = vadd.f32 1.0, %v373_v43  ;;  %vm377_vm3 = vcmp.lt.f32.partialorder %v376_v48, 0.0004427343 }
 0x2eb   :  { %507 = vtanh.f32 %v361_v33  ;;  %v384_v52 = vmul.f32 %v500_v38, %v383_v44 }
 0x2ec   :  { %509 = vtanh.f32 %v356_v35  ;;  %v375_v55 = vmul.f32 %v502_v39, %v374_v46 }
 0x2f3   :  { %v504_v49 = vpop.eup %503 }
 0x2f4   :  { %v506_v50 = vpop.eup %505  ;;  %v381_v51 = vmul.f32 0.6931472, %v504_v49 }
 0x2f5   :  { %v372_v54 = vmul.f32 0.6931472, %v506_v50  ;;  %v508_v61 = vpop.eup %507 }
 0x2f6   :  { %v387_v56 = vsel %vm386_vm2, %v384_v52, %v381_v51  ;;  %v510_v63 = vpop.eup %509 }
 0x2f7   :  { %v378_v57 = vsel %vm377_vm3, %v375_v55, %v372_v54  ;;  %v389_v58 = vadd.f32 1e-05, %v387_v56 }
 0x2f8   :  { %v388_v59 = vadd.f32 1e-05, %v378_v57 }
 0x2f9   :  { %v391_v60 = vmin.f32 %v389_v58, 1.0 }
 0x2fa   :  { %v390_v62 = vmin.f32 %v388_v59, 1.0 }
 0x2fb   :  { %v396_v0 = vsel %vm394_vm4, %v508_v61, %v391_v60 }
 0x2fc   :  { %v395_v1 = vsel %vm394_vm4, %v510_v63, %v390_v62  ;;  %398 = vst [vmem:[#allocation10 + $0x8] sm:$0xff] %v396_v0 }
 0x2fd   :  { %397 = vst [vmem:[#allocation10] sm:$0xff] %v395_v1 }
 0x2fe   :  { %610 = shalt.err (!%p607_p8)
}
 0x2ff   :  { %s611_s11 = scalar_lea.hbm %s785_s7, 256 }
 0x300   :  { %p612_p9 = scmp.ne.s32.totalorder %s785_s7, %s611_s11  ;;  %p615_p10 = scmp.lt.u32.totalorder %s611_s11, %s785_s7 }
 0x302   :  { %p617_p11 = pnand %p615_p10, %p612_p9 }
 0x304   :  { %620 = shalt.err (!%p617_p11)
}
 0x305   :  { %410 = dma.vmem_to_hbm [thread:$0]  %s405_s6, 256, %s785_s7, [#allocation4], %s631_s13, %s631_s13, %s632_s14  }
 0x306   :  { %627 = dma.done.wait [#allocation4], 256  }
 0x307   :  { %628 = vsyncadd [#allocation4], 4294967040 }
 0x308   :  { %414 = vsyncpa [#allocation3], 1 }
 0x309   :  { %415 = vsyncpa [#allocation6], 1 }
 0x30a   :  { %416 = vsyncpa [#allocation9], 1 }
 0x30b   :  { %417 = vsyncpa [#allocation4], 1 }

</bundles_post_ra>
